<compile_context>
chip_gen: v6e
topology: v6e:2x2x1
jax: 0.10.0
libtpu: 0.0.40
codegen_flags: <defaults>
</compile_context>

<pallas_src>
import functools

import jax
import jax.numpy as jnp
from jax.experimental import pallas as pl
from jax.experimental.pallas import tpu as pltpu


def _vmem_budgets():
    """Return (vmem_limit_bytes, tile_budget_bytes), TPU-generation aware."""
    try:
        cap = int(getattr(pltpu.get_tpu_info(), "vmem_capacity_bytes", 128 << 20))
    except Exception:               # conservative fallback if the query fails
        cap = 128 << 20
    if cap <= (64 << 20):           # v7x-class: 64 MiB physical VMEM
        return 36 << 20, 12 << 20
    return 64 << 20, 16 << 20       # v5e / v6e: 128 MiB physical VMEM


def _choose_block_rows(n_rows, d, itemsize, tile_budget):
    """Sublane-aligned row tile: large enough to hide DMA, small enough for VMEM,
    leaving >= ~4 grid steps (>= 2 per TensorCore on v7x, pipeline depth elsewhere)."""
    row_align = 8 * max(1, 4 // max(1, itemsize))   # 8 (f32) / 16 (bf16) / 32 (int8)
    if n_rows <= row_align:
        return n_rows                               # single full-extent block
    # Per element per tile: double-buffered input + output tiles (native dtype)
    # plus ~3 live full-tile f32 temporaries (x_f32 / diff / pre-cast output).
    bytes_per_elem = 2 * itemsize + 2 * itemsize + 12
    max_rows = max(row_align, tile_budget // max(1, d * bytes_per_elem))
    block = min(1024, max_rows)                     # mem-bound plateau ~512-1024 rows
    block = min(block, max(row_align, -(-n_rows // 4)))   # keep grid length >= ~4
    return max(row_align, (block // row_align) * row_align)


def _fn_rows_kernel(x_ref, gamma_ref, beta_ref, o_ref):
    # x_ref: (TR, D) row tile; gamma/beta: (1, D) f32, grid-invariant / VMEM-resident.
    x = x_ref[...].astype(jnp.float32)
    d = x.shape[-1]
    mu = jnp.mean(x, axis=-1, keepdims=True)
    diff = x - mu
    # Unbiased variance (Bessel correction) to match torch.std default.
    var = jnp.sum(diff * diff, axis=-1, keepdims=True) * jnp.float32(1.0 / (d - 1))
    sigma = jnp.sqrt(var)
    o_ref[...] = (gamma_ref[...] * (diff / (sigma + jnp.float32(1e-6)))
                  + beta_ref[...]).astype(o_ref.dtype)


def _fn_packed_kernel(x_ref, gamma_ref, beta_ref, seg_ref, o_ref, *, d):
    # x_ref: (TR, P*D) lane-dense tile holding P = 128//D logical rows per lane row.
    # seg_ref: (P*D, P*D) block-diagonal ones matrix; x @ seg broadcasts each
    # segment's sum across that segment (segmented reduce on the otherwise-idle MXU).
    x = x_ref[...].astype(jnp.float32)
    seg = seg_ref[...]
    mu = jnp.dot(x, seg, preferred_element_type=jnp.float32) * jnp.float32(1.0 / d)
    diff = x - mu
    var = (jnp.dot(diff * diff, seg, preferred_element_type=jnp.float32)
           * jnp.float32(1.0 / (d - 1)))
    sigma = jnp.sqrt(var)
    o_ref[...] = (gamma_ref[...] * (diff / (sigma + jnp.float32(1e-6)))
                  + beta_ref[...]).astype(o_ref.dtype)


def _launch(kernel, x2, params, block_rows, vmem_limit):
    n, d = x2.shape
    grid = (pl.cdiv(n, block_rows),)   # partial last block is masked by Pallas
    param_specs = [pl.BlockSpec(p.shape, lambda i: (0, 0)) for p in params]
    return pl.pallas_call(
        kernel,
        out_shape=jax.ShapeDtypeStruct((n, d), x2.dtype),
        grid_spec=pltpu.PrefetchScalarGridSpec(
            num_scalar_prefetch=0,
            grid=grid,
            in_specs=[pl.BlockSpec((block_rows, d), lambda i: (i, 0))] + param_specs,
            out_specs=pl.BlockSpec((block_rows, d), lambda i: (i, 0)),
        ),
        compiler_params=pltpu.CompilerParams(
            dimension_semantics=("parallel",),
            vmem_limit_bytes=vmem_limit,
        ),
    )(x2, *params)


@functools.partial(jax.jit, static_argnames=("block_rows",))
def feature_normalizer(x, gamma, beta, *, block_rows=None):
    """x: (..., D); gamma, beta: (D,).  Matches FeatureNormalizer.forward."""
    orig_shape = x.shape
    d = orig_shape[-1]
    # TODO(synk): D == 1 matches torch's NaN only up to a trace-time divide by
    # zero in the (D-1) Bessel factor; guard upstream if such shapes occur.
    x2 = x.reshape(-1, d)
    n = x2.shape[0]
    vmem_limit, tile_budget = _vmem_budgets()

    gamma_f = gamma.reshape(1, d).astype(jnp.float32)
    beta_f = beta.reshape(1, d).astype(jnp.float32)

    pack = 128 // d if (1 < d < 128 and 128 % d == 0) else 1
    if pack > 1 and n % pack == 0:
        # Lane-packing path: loads/stores use all 128 lanes (no masked stores).
        lanes = pack * d                                    # == 128
        xp = x2.reshape(n // pack, lanes)                   # free reshape in XLA
        seg_ids = jnp.arange(lanes) // d
        seg = (seg_ids[:, None] == seg_ids[None, :]).astype(jnp.float32)
        gamma_p = jnp.tile(gamma_f, (1, pack))
        beta_p = jnp.tile(beta_f, (1, pack))
        if block_rows is None:
            block_rows = _choose_block_rows(n // pack, lanes, x.dtype.itemsize,
                                            tile_budget)
        out = _launch(functools.partial(_fn_packed_kernel, d=d),
                      xp, (gamma_p, beta_p, seg), block_rows, vmem_limit)
        return out.reshape(orig_shape)

    # TODO(synk): when D < 128 but n % pack != 0, run the bulk through the packed
    # path and only the < pack-row tail through this simple path.
    if block_rows is None:
        block_rows = _choose_block_rows(n, d, x.dtype.itemsize, tile_budget)
    out = _launch(_fn_rows_kernel, x2, (gamma_f, beta_f), block_rows, vmem_limit)
    return out.reshape(orig_shape)


def _ref(x, gamma, beta):
    d = x.shape[-1]
    mu = jnp.mean(x, axis=-1, keepdims=True)
    sigma = jnp.sqrt(jnp.sum((x - mu) ** 2, axis=-1, keepdims=True) / (d - 1))
    return gamma * (x - mu) / (sigma + 1e-6) + beta


if __name__ == "__main__":
    key = jax.random.PRNGKey(0)
    k1, k2, k3 = jax.random.split(key, 3)

    # 1) D < 128 -> lane-packed path (batch=2, seq=8, dim=32 as the module implies).
    B, S, D = 2, 8, 32
    x1 = jax.random.normal(k1, (B, S, D), dtype=jnp.float32)
    gamma1 = jnp.ones((D,), jnp.float32)          # nn.Parameter(torch.ones(dim))
    beta1 = jnp.zeros((D,), jnp.float32)          # nn.Parameter(torch.zeros(dim))
    o1 = jax.block_until_ready(feature_normalizer(x1, gamma1, beta1))
    # Only the MXU segmented-sum passes are potentially sub-f32 (typically ~1e-6
    # error); the bound also covers a worst-case bf16-pass matmul lowering.
    assert jnp.allclose(o1, _ref(x1, gamma1, beta1), atol=5e-3, rtol=5e-3)

    # 2) D >= 128 -> simple row path, row count not divisible by the block
    #    (exercises the masked partial last block that replaced jnp.pad).
    x2 = jax.random.normal(k2, (3, 5, 256), dtype=jnp.float32)
    gamma2 = jnp.full((256,), 1.5, jnp.float32)
    beta2 = jnp.full((256,), 0.25, jnp.float32)
    o2 = jax.block_until_ready(feature_normalizer(x2, gamma2, beta2))
    assert jnp.allclose(o2, _ref(x2, gamma2, beta2), atol=1e-4, rtol=1e-4)

    # 3) D < 128 but rows not divisible by the pack factor -> fallback row path.
    x3 = jax.random.normal(k3, (3, 5, 32), dtype=jnp.float32)
    o3 = jax.block_until_ready(feature_normalizer(x3, gamma1, beta1))
    assert jnp.allclose(o3, _ref(x3, gamma1, beta1), atol=1e-4, rtol=1e-4)

    print("KERNEL_OK")
</pallas_src>

<mosaic_0001>
module attributes {stable_mosaic.version = 11 : i64} {
  func.func @_fn_packed_kernel(%arg0: i32, %arg1: memref<4x128xf32, #tpu.memory_space<vmem>>, %arg2: memref<1x128xf32, #tpu.memory_space<vmem>>, %arg3: memref<1x128xf32, #tpu.memory_space<vmem>>, %arg4: memref<128x128xf32, #tpu.memory_space<vmem>>, %arg5: memref<4x128xf32, #tpu.memory_space<vmem>>) attributes {dimension_semantics = [#tpu.dimension_semantics<parallel>], iteration_bounds = array<i64: 1>, scalar_prefetch = 0 : i64, scratch_operands = 0 : i64, tpu.core_type = #tpu.core_type<tc>, window_params = [{transform_indices = @transform_0, window_bounds = array<i64: 4, 128>}, {pipeline_mode = #tpu.pipeline_mode<synchronous>, transform_indices = @transform_1, window_bounds = array<i64: 1, 128>}, {pipeline_mode = #tpu.pipeline_mode<synchronous>, transform_indices = @transform_2, window_bounds = array<i64: 1, 128>}, {pipeline_mode = #tpu.pipeline_mode<synchronous>, transform_indices = @transform_3, window_bounds = array<i64: 128, 128>}, {transform_indices = @transform_4, window_bounds = array<i64: 4, 128>}]} {
    %c0 = arith.constant 0 : index
    %c0_0 = arith.constant 0 : index
    %0 = vector.load %arg1[%c0, %c0_0] : memref<4x128xf32, #tpu.memory_space<vmem>>, vector<4x128xf32>
    %c0_1 = arith.constant 0 : index
    %c0_2 = arith.constant 0 : index
    %1 = vector.load %arg4[%c0_1, %c0_2] : memref<128x128xf32, #tpu.memory_space<vmem>>, vector<128x128xf32>
    %cst = arith.constant dense<0.000000e+00> : vector<4x128xf32>
    %2 = tpu.matmul %0, %1, %cst {dimension_numbers = #tpu.dot_dimension_numbers<[1], [0], [0], [1], [0, 0, 1, 1], [], []>} : vector<4x128xf32>, vector<128x128xf32>, vector<4x128xf32> -> vector<4x128xf32>
    %cst_3 = arith.constant 3.125000e-02 : f32
    %3 = vector.broadcast %cst_3 : f32 to vector<4x128xf32>
    %4 = arith.mulf %2, %3 : vector<4x128xf32>
    %5 = arith.subf %0, %4 : vector<4x128xf32>
    %6 = arith.mulf %5, %5 : vector<4x128xf32>
    %cst_4 = arith.constant dense<0.000000e+00> : vector<4x128xf32>
    %7 = tpu.matmul %6, %1, %cst_4 {dimension_numbers = #tpu.dot_dimension_numbers<[1], [0], [0], [1], [0, 0, 1, 1], [], []>} : vector<4x128xf32>, vector<128x128xf32>, vector<4x128xf32> -> vector<4x128xf32>
    %cst_5 = arith.constant 0.0322580636 : f32
    %8 = vector.broadcast %cst_5 : f32 to vector<4x128xf32>
    %9 = arith.mulf %7, %8 : vector<4x128xf32>
    %10 = math.sqrt %9 : vector<4x128xf32>
    %c0_6 = arith.constant 0 : index
    %c0_7 = arith.constant 0 : index
    %11 = vector.load %arg2[%c0_6, %c0_7] : memref<1x128xf32, #tpu.memory_space<vmem>>, vector<1x128xf32>
    %cst_8 = arith.constant 9.99999997E-7 : f32
    %12 = vector.broadcast %cst_8 : f32 to vector<4x128xf32>
    %13 = arith.addf %10, %12 : vector<4x128xf32>
    %14 = arith.divf %5, %13 : vector<4x128xf32>
    %15 = vector.broadcast %11 : vector<1x128xf32> to vector<4x128xf32>
    %16 = arith.mulf %15, %14 : vector<4x128xf32>
    %c0_9 = arith.constant 0 : index
    %c0_10 = arith.constant 0 : index
    %17 = vector.load %arg3[%c0_9, %c0_10] : memref<1x128xf32, #tpu.memory_space<vmem>>, vector<1x128xf32>
    %18 = vector.broadcast %17 : vector<1x128xf32> to vector<4x128xf32>
    %19 = arith.addf %16, %18 : vector<4x128xf32>
    %c0_11 = arith.constant 0 : index
    %c0_12 = arith.constant 0 : index
    %20 = vector.load %arg5[%c0_11, %c0_12] : memref<4x128xf32, #tpu.memory_space<vmem>>, vector<4x128xf32>
    tpu.vector_store %arg5[%c0_11, %c0_12], %19 {strides = array<i32>} : memref<4x128xf32, #tpu.memory_space<vmem>>, vector<4x128xf32>,
    return
  }
  func.func @transform_0(%arg0: i32) -> (i32, i32) {
    %c0_i32 = arith.constant 0 : i32
    %c0_i32_0 = arith.constant 0 : i32
    return %arg0, %c0_i32 : i32, i32
  }
  func.func @transform_1(%arg0: i32) -> (i32, i32) {
    %c0_i32 = arith.constant 0 : i32
    %c0_i32_0 = arith.constant 0 : i32
    %c0_i32_1 = arith.constant 0 : i32
    return %c0_i32, %c0_i32_0 : i32, i32
  }
  func.func @transform_2(%arg0: i32) -> (i32, i32) {
    %c0_i32 = arith.constant 0 : i32
    %c0_i32_0 = arith.constant 0 : i32
    %c0_i32_1 = arith.constant 0 : i32
    return %c0_i32, %c0_i32_0 : i32, i32
  }
  func.func @transform_3(%arg0: i32) -> (i32, i32) {
    %c0_i32 = arith.constant 0 : i32
    %c0_i32_0 = arith.constant 0 : i32
    %c0_i32_1 = arith.constant 0 : i32
    return %c0_i32, %c0_i32_0 : i32, i32
  }
  func.func @transform_4(%arg0: i32) -> (i32, i32) {
    %c0_i32 = arith.constant 0 : i32
    %c0_i32_0 = arith.constant 0 : i32
    return %arg0, %c0_i32 : i32, i32
  }
}

</mosaic_0001>

<bundles_post_ra>
// kernel: feature_normalizer.1
= control target key start
LH: loop header
LB: loop body
LE: loop exit
PB: predicated region body
PF: predicated region fallthrough
CT: control target
= control target key end

     0   :  { %v321_v0 = vmov 0.0   ;;  %vm322_vm0 = vmmov 0   ;;  %s444_s3 = inlined_call_operand.vmem [shape: f32[128,128], index: 3, kind: input, shape index: {}]   ;;  %s445_s0 = inlined_call_operand.vmem [shape: f32[4,128], index: 0, kind: input, shape index: {}]   ;;  %s446_s1 = inlined_call_operand.vmem [shape: f32[1,128], index: 1, kind: input, shape index: {}]   ;;  %s447_s2 = inlined_call_operand.vmem [shape: f32[1,128], index: 2, kind: input, shape index: {}]   ;;  %s448_s4 = inlined_call_operand.vmem [shape: f32[4,128], index: 4, kind: output, shape index: {}]  }
   0x1   :  { %245 = vmatprep.subr.mxu0 %v321_v0  ;;  %v33_v1 = vld [vmem:[%s444_s3 + $0x78] sm:$0xff]  ;;  %v32_v2 = vld [vmem:[%s444_s3 + $0x70] sm:$0xff]  ;;  %277 = vmatprep.mubr.msk.f32.mxu0 %vm322_vm0, %v321_v0  ;;  %v31_v3 = vld [vmem:[%s444_s3 + $0x68] sm:$0xff] }
   0x2   :  { %246 = vmatpush3.msra.mxu0 %v33_v1  ;;  %280 = vmatprep.subr.mxu1 %v321_v0  ;;  %v30_v4 = vld [vmem:[%s444_s3 + $0x60] sm:$0xff]  ;;  %v29_v5 = vld [vmem:[%s444_s3 + $0x58] sm:$0xff]  ;;  %v28_v6 = vld [vmem:[%s444_s3 + $0x50] sm:$0xff] }
   0x3   :  { %247 = vmatprep.subr.mxu0 %v321_v0  ;;  %281 = vmatpush3.msra.mxu1 %v33_v1  ;;  %v27_v7 = vld [vmem:[%s444_s3 + $0x48] sm:$0xff]  ;;  %v26_v8 = vld [vmem:[%s444_s3 + $0x40] sm:$0xff]  ;;  %v25_v9 = vld [vmem:[%s444_s3 + $0x38] sm:$0xff] }
   0x4   :  { %248 = vmatpush3.msra.mxu0 %v32_v2  ;;  %282 = vmatprep.subr.mxu1 %v321_v0  ;;  %v24_v10 = vld [vmem:[%s444_s3 + $0x30] sm:$0xff]  ;;  %v23_v11 = vld [vmem:[%s444_s3 + $0x28] sm:$0xff]  ;;  %v22_v12 = vld [vmem:[%s444_s3 + $0x20] sm:$0xff] }
   0x5   :  { %249 = vmatprep.subr.mxu0 %v321_v0  ;;  %283 = vmatpush3.msra.mxu1 %v32_v2  ;;  %v21_v13 = vld [vmem:[%s444_s3 + $0x18] sm:$0xff]  ;;  %v20_v14 = vld [vmem:[%s444_s3 + $0x10] sm:$0xff]  ;;  %v19_v15 = vld [vmem:[%s444_s3 + $0x8] sm:$0xff] }
   0x6   :  { %250 = vmatpush3.msra.mxu0 %v31_v3  ;;  %284 = vmatprep.subr.mxu1 %v321_v0  ;;  %v18_v16 = vld [vmem:[%s444_s3] sm:$0xff] }
   0x7   :  { %251 = vmatprep.subr.mxu0 %v321_v0  ;;  %285 = vmatpush3.msra.mxu1 %v31_v3  ;;  %v17_v17 = vld [vmem:[%s445_s0] sm:$0xf] }
   0x8   :  { %252 = vmatpush3.msra.mxu0 %v30_v4  ;;  %286 = vmatprep.subr.mxu1 %v321_v0  ;;  %v209_v33 = vld [vmem:[%s446_s1] ss:$0 sm:$0xff] }
   0x9   :  { %253 = vmatprep.subr.mxu0 %v321_v0  ;;  %287 = vmatpush3.msra.mxu1 %v30_v4  ;;  %v210_v35 = vld [vmem:[%s447_s2] ss:$0 sm:$0xff] }
   0xa   :  { %254 = vmatpush3.msra.mxu0 %v29_v5  ;;  %288 = vmatprep.subr.mxu1 %v321_v0 }
   0xb   :  { %255 = vmatprep.subr.mxu0 %v321_v0  ;;  %289 = vmatpush3.msra.mxu1 %v29_v5 }
   0xc   :  { %256 = vmatpush3.msra.mxu0 %v28_v6  ;;  %290 = vmatprep.subr.mxu1 %v321_v0 }
   0xd   :  { %257 = vmatprep.subr.mxu0 %v321_v0  ;;  %291 = vmatpush3.msra.mxu1 %v28_v6 }
   0xe   :  { %258 = vmatpush3.msra.mxu0 %v27_v7  ;;  %292 = vmatprep.subr.mxu1 %v321_v0 }
   0xf   :  { %259 = vmatprep.subr.mxu0 %v321_v0  ;;  %293 = vmatpush3.msra.mxu1 %v27_v7 }
  0x10   :  { %260 = vmatpush3.msra.mxu0 %v26_v8  ;;  %294 = vmatprep.subr.mxu1 %v321_v0 }
  0x11   :  { %261 = vmatprep.subr.mxu0 %v321_v0  ;;  %295 = vmatpush3.msra.mxu1 %v26_v8 }
  0x12   :  { %262 = vmatpush3.msra.mxu0 %v25_v9  ;;  %296 = vmatprep.subr.mxu1 %v321_v0 }
  0x13   :  { %263 = vmatprep.subr.mxu0 %v321_v0  ;;  %297 = vmatpush3.msra.mxu1 %v25_v9 }
  0x14   :  { %264 = vmatpush3.msra.mxu0 %v24_v10  ;;  %298 = vmatprep.subr.mxu1 %v321_v0 }
  0x15   :  { %265 = vmatprep.subr.mxu0 %v321_v0  ;;  %299 = vmatpush3.msra.mxu1 %v24_v10 }
  0x16   :  { %266 = vmatpush3.msra.mxu0 %v23_v11  ;;  %300 = vmatprep.subr.mxu1 %v321_v0 }
  0x17   :  { %267 = vmatprep.subr.mxu0 %v321_v0  ;;  %301 = vmatpush3.msra.mxu1 %v23_v11 }
  0x18   :  { %268 = vmatpush3.msra.mxu0 %v22_v12  ;;  %302 = vmatprep.subr.mxu1 %v321_v0 }
  0x19   :  { %269 = vmatprep.subr.mxu0 %v321_v0  ;;  %303 = vmatpush3.msra.mxu1 %v22_v12 }
  0x1a   :  { %270 = vmatpush3.msra.mxu0 %v21_v13  ;;  %304 = vmatprep.subr.mxu1 %v321_v0 }
  0x1b   :  { %271 = vmatprep.subr.mxu0 %v321_v0  ;;  %305 = vmatpush3.msra.mxu1 %v21_v13 }
  0x1c   :  { %272 = vmatpush3.msra.mxu0 %v20_v14  ;;  %306 = vmatprep.subr.mxu1 %v321_v0 }
  0x1d   :  { %273 = vmatprep.subr.mxu0 %v321_v0  ;;  %307 = vmatpush3.msra.mxu1 %v20_v14 }
  0x1e   :  { %274 = vmatpush3.msra.mxu0 %v19_v15  ;;  %308 = vmatprep.subr.mxu1 %v321_v0 }
  0x1f   :  { %275 = vmatprep.subr.mxu0 %v321_v0  ;;  %309 = vmatpush3.msra.mxu1 %v19_v15 }
  0x20   :  { %276 = vmatpush3.msra.mxu0 %v18_v16  ;;  %310 = vmatprep.subr.mxu1 %v321_v0 }
  0x21   :  { %278 = vmatmul.mubr.f32.vlgmr.msra.gmra.mxu0 %v17_v17  ;;  %311 = vmatpush3.msra.mxu1 %v18_v16 }
  0x22   :  { %312 = vmatprep.mubr.msk.f32.mxu1 %vm322_vm0, %v321_v0 }
  0xe1   :  { %v100_v18 = vpop.f32.mrf.mxu0 }
  0xe2   :  { %v104_v19 = vmul.f32 0.03125, %v100_v18 }
  0xe3   :  { %v279_v20 = vpop.f32.mrf.mxu0 }
  0xe4   :  { %v105_v21 = vsub.f32 %v17_v17, %v104_v19 }
  0xe6   :  { %v106_v22 = vmul.f32 %v105_v21, %v105_v21 }
  0xe8   :  { %313 = vmatmul.mubr.f32.vlgmr.msra.gmra.mxu1 %v106_v22 }
 0x1a8   :  { %v173_v23 = vpop.f32.mrf.mxu1 }
 0x1a9   :  { %v177_v24 = vmul.f32 0.032258064, %v173_v23 }
 0x1aa   :  { %v314_v25 = vpop.f32.mrf.mxu1 }
 0x1ab   :  { %317 = vrsqrt.f32 %v177_v24  ;;  %vm180_vm1 = vcmp.eq.f32.partialorder %v177_v24, inf  ;;  %v183_v28 = vand.u32 2147483648, %v177_v24  ;;  %vm182_vm2 = vcmp.eq.f32.partialorder %v177_v24, 0.0 }
 0x1b8   :  { %v318_v26 = vpop.eup %317 }
 0x1b9   :  { %v179_v27 = vmul.f32 %v318_v26, %v177_v24 }
 0x1bb   :  { %v181_v29 = vsel %vm180_vm1, %v177_v24, %v179_v27 }
 0x1bc   :  { %v184_v30 = vsel %vm182_vm2, %v183_v28, %v181_v29 }
 0x1bd   :  { %v186_v31 = vadd.f32 1e-06, %v184_v30 }
 0x1bf   :  { %319 = vrcp.f32 %v186_v31 }
 0x1cc   :  { %v320_v32 = vpop.eup %319 }
 0x1cd   :  { %v188_v34 = vmul.f32 %v320_v32, %v105_v21 }
 0x1cf   :  { %v195_v36 = vmul.f32 %v209_v33, %v188_v34 }
 0x1d1   :  { %v203_v37 = vadd.f32 %v210_v35, %v195_v36 }
 0x1d3   :  { %204 = vst [vmem:[%s448_s4] sm:$0xf] %v203_v37 }

</bundles_post_ra>
